<compile_context>
chip_gen: v5e
topology: v5e:2x2
jax: 0.10.0
libtpu: 0.0.40
codegen_flags: <defaults>
</compile_context>

<pallas_src>
import functools

import jax
import jax.numpy as jnp
from jax.experimental import pallas as pl
from jax.experimental.pallas import tpu as pltpu


def _round_up(x, m):
    return ((x + m - 1) // m) * m


# ---------------------------------------------------------------------------
# Kernel (batch on the lane axis; one batch tile per grid step)
# ---------------------------------------------------------------------------
def actor_kernel(xT_ref, w1_ref, b1_ref, w2_ref, b2_ref, outT_ref):
    """xT_ref: [S, TB], w1: [F, S], b1: [F, 1], w2: [A, F], b2: [A, 1],
    outT_ref: [A, TB].  Weights/biases use constant index_maps so they are
    DMA'd once and stay VMEM-resident across all grid steps."""
    x_t = xT_ref[...]                                              # [S, TB] f32

    # fc layer: h^T = W1 @ x^T + b1 ; ReLU.  f32 matmul, f32 accumulate.
    h_t = jnp.dot(w1_ref[...], x_t,
                  preferred_element_type=jnp.float32) + b1_ref[...]   # [F, TB]
    h_t = jnp.maximum(h_t, 0.0)

    # action layer: logits^T = W2 @ h^T + b2.
    logits_t = jnp.dot(w2_ref[...], h_t,
                       preferred_element_type=jnp.float32) + b2_ref[...]  # [A, TB]

    # Numerically-stable softmax over the action axis (axis 0 here), exact divide.
    m = jnp.max(logits_t, axis=0, keepdims=True)                   # [1, TB]
    e = jnp.exp(logits_t - m)                                      # [A, TB]
    denom = jnp.sum(e, axis=0, keepdims=True)                      # [1, TB]
    outT_ref[...] = (e / denom).astype(outT_ref.dtype)


# ---------------------------------------------------------------------------
# Parameter handling (one-time conversion; weights keep torch [out, in] layout)
# ---------------------------------------------------------------------------
def params_from_torch_layout(w_fc, b_fc, w_action, b_action):
    """PyTorch-layout params: weights [out, in], biases [out].  Kept in f32 and
    in the [out, in] layout (the batch-on-lanes kernel wants exactly that);
    biases become [out, 1] columns so they broadcast across the lane axis."""
    return {
        "w1": jnp.asarray(w_fc, dtype=jnp.float32),                 # [F, S]
        "b1": jnp.asarray(b_fc, dtype=jnp.float32).reshape(-1, 1),  # [F, 1]
        "w2": jnp.asarray(w_action, dtype=jnp.float32),             # [A, F]
        "b2": jnp.asarray(b_action, dtype=jnp.float32).reshape(-1, 1),  # [A, 1]
    }


def init_actor_params(key, state_dim, action_dim, fc_dim=10):
    """nn.Linear-style init (uniform(-1/sqrt(fan_in), 1/sqrt(fan_in)))."""
    k1, k2, k3, k4 = jax.random.split(key, 4)
    lim1 = 1.0 / float(state_dim) ** 0.5
    lim2 = 1.0 / float(fc_dim) ** 0.5
    w_fc = jax.random.uniform(k1, (fc_dim, state_dim), jnp.float32, -lim1, lim1)
    b_fc = jax.random.uniform(k2, (fc_dim,), jnp.float32, -lim1, lim1)
    w_action = jax.random.uniform(k3, (action_dim, fc_dim), jnp.float32, -lim2, lim2)
    b_action = jax.random.uniform(k4, (action_dim,), jnp.float32, -lim2, lim2)
    return params_from_torch_layout(w_fc, b_fc, w_action, b_action)


# ---------------------------------------------------------------------------
# Batch-tile selection (padding-aware VMEM estimate; single step if possible)
# ---------------------------------------------------------------------------
_VMEM_LIMIT_BYTES = 32 * 1024 * 1024   # safe scoped limit on all of v5e/v6e/v7x
_VMEM_BUDGET = 20 * 1024 * 1024        # headroom under the scoped limit


def _padded_vmem_bytes(tb, S, F, A):
    """VMEM bytes for one batch tile, accounting for (sublane=8, lane=128) padding."""
    lanes = _round_up(tb, 128)
    x_b = _round_up(S, 8) * lanes * 4
    out_b = _round_up(A, 8) * lanes * 4
    h_b = _round_up(F, 8) * lanes * 4
    lg_b = _round_up(A, 8) * lanes * 4
    w_b = (_round_up(F, 8) * _round_up(S, 128)
           + _round_up(A, 8) * _round_up(F, 128)) * 4
    bias_b = 2 * 8 * 128 * 4
    # x/out blocks are double-buffered by the pipeline; h/logits/exp temporaries ~3x.
    return 2 * (x_b + out_b) + 3 * (h_b + lg_b) + w_b + bias_b


def _choose_tile_b(B, S, F, A):
    """Whole batch in one step if it fits; otherwise lane-aligned (128x) tiles."""
    if _padded_vmem_bytes(B, S, F, A) <= _VMEM_BUDGET:
        return B, 1
    tb = _round_up(pl.cdiv(B, 2), 128)
    while tb > 128 and _padded_vmem_bytes(tb, S, F, A) > _VMEM_BUDGET:
        tb = _round_up(pl.cdiv(tb, 2), 128)
    return tb, pl.cdiv(B, tb)


# ---------------------------------------------------------------------------
# Forward wrapper
# ---------------------------------------------------------------------------
@functools.partial(jax.jit, static_argnames=())
def actor_forward(state, params):
    """state: [B, state_dim] f32; returns softmax probabilities [B, action_dim]."""
    w1, b1, w2, b2 = params["w1"], params["b1"], params["w2"], params["b2"]
    B, S = state.shape
    F = w1.shape[0]
    A = w2.shape[0]

    tile_b, num_steps = _choose_tile_b(B, S, F, A)

    # Layout plumbing (not compute hoisting): put the batch on the 128-wide lane
    # axis so every in-kernel load/store is lane-dense and unmasked.
    x_t = state.T                                                   # [S, B]

    flops = 2 * B * (S * F + F * A)
    bytes_accessed = (B * S * 4                     # state
                      + (S * F + F * A) * 4         # weights (read once, resident)
                      + (F + A) * 4                 # biases
                      + B * A * 4)                  # output
    cost = pl.CostEstimate(flops=flops, transcendentals=B * A,
                           bytes_accessed=bytes_accessed)

    out_t = pl.pallas_call(
        actor_kernel,
        out_shape=jax.ShapeDtypeStruct((A, B), jnp.float32),
        grid=(num_steps,),
        in_specs=[
            pl.BlockSpec((S, tile_b), lambda i: (0, i)),   # x^T: tiled over batch lanes
            pl.BlockSpec((F, S), lambda i: (0, 0)),        # w1: VMEM-resident
            pl.BlockSpec((F, 1), lambda i: (0, 0)),        # b1: VMEM-resident
            pl.BlockSpec((A, F), lambda i: (0, 0)),        # w2: VMEM-resident
            pl.BlockSpec((A, 1), lambda i: (0, 0)),        # b2: VMEM-resident
        ],
        out_specs=pl.BlockSpec((A, tile_b), lambda i: (0, i)),
        compiler_params=pltpu.CompilerParams(
            dimension_semantics=("parallel",),             # batch axis is independent
            vmem_limit_bytes=_VMEM_LIMIT_BYTES),
        cost_estimate=cost,
    )(x_t, w1, b1, w2, b2)

    return out_t.T                                                  # [B, A]


# ---------------------------------------------------------------------------
# Pure-JAX reference (f32 end to end, matches the PyTorch module)
# ---------------------------------------------------------------------------
def _ref_forward(state, params):
    h = jnp.dot(state, params["w1"].T) + params["b1"].reshape(1, -1)
    h = jnp.maximum(h, 0.0)
    logits = jnp.dot(h, params["w2"].T) + params["b2"].reshape(1, -1)
    return jax.nn.softmax(logits, axis=-1)


if __name__ == "__main__":
    # Small shapes consistent with the module (fc_dim defaults to 10).
    batch, state_dim, fc_dim, action_dim = 32, 16, 10, 4

    key = jax.random.PRNGKey(0)
    k_params, k_x = jax.random.split(key)
    params = init_actor_params(k_params, state_dim, action_dim, fc_dim)
    state = jax.random.normal(k_x, (batch, state_dim), dtype=jnp.float32)

    out = actor_forward(state, params)
    out = jax.block_until_ready(out)

    ref = _ref_forward(state, params)
    assert out.shape == (batch, action_dim)
    assert jnp.allclose(out, ref, atol=1e-5, rtol=1e-5), "mismatch vs JAX reference"
    assert jnp.allclose(jnp.sum(out, axis=-1), 1.0, atol=1e-5), "softmax rows must sum to 1"

    # TODO(synk): optimizer (Adam), lr, and device plumbing from the PyTorch module are
    # training-only state with no forward-pass Pallas equivalent.
    print("KERNEL_OK")
</pallas_src>

<mosaic_0001>
module attributes {stable_mosaic.version = 11 : i64} {
  func.func @actor_kernel(%arg0: i32, %arg1: memref<16x32xf32, #tpu.memory_space<vmem>>, %arg2: memref<10x16xf32, #tpu.memory_space<vmem>>, %arg3: memref<10x1xf32, #tpu.memory_space<vmem>>, %arg4: memref<4x10xf32, #tpu.memory_space<vmem>>, %arg5: memref<4x1xf32, #tpu.memory_space<vmem>>, %arg6: memref<4x32xf32, #tpu.memory_space<vmem>>) attributes {dimension_semantics = [#tpu.dimension_semantics<parallel>], iteration_bounds = array<i64: 1>, scalar_prefetch = 0 : i64, scratch_operands = 0 : i64, tpu.core_type = #tpu.core_type<tc>, window_params = [{transform_indices = @transform_0, window_bounds = array<i64: 16, 32>}, {pipeline_mode = #tpu.pipeline_mode<synchronous>, transform_indices = @transform_1, window_bounds = array<i64: 10, 16>}, {pipeline_mode = #tpu.pipeline_mode<synchronous>, transform_indices = @transform_2, window_bounds = array<i64: 10, 1>}, {pipeline_mode = #tpu.pipeline_mode<synchronous>, transform_indices = @transform_3, window_bounds = array<i64: 4, 10>}, {pipeline_mode = #tpu.pipeline_mode<synchronous>, transform_indices = @transform_4, window_bounds = array<i64: 4, 1>}, {transform_indices = @transform_5, window_bounds = array<i64: 4, 32>}]} {
    %c0 = arith.constant 0 : index
    %c0_0 = arith.constant 0 : index
    %0 = vector.load %arg1[%c0, %c0_0] : memref<16x32xf32, #tpu.memory_space<vmem>>, vector<16x32xf32>
    %c0_1 = arith.constant 0 : index
    %c0_2 = arith.constant 0 : index
    %1 = vector.load %arg2[%c0_1, %c0_2] : memref<10x16xf32, #tpu.memory_space<vmem>>, vector<10x16xf32>
    %cst = arith.constant dense<0.000000e+00> : vector<10x32xf32>
    %2 = tpu.matmul %1, %0, %cst {dimension_numbers = #tpu.dot_dimension_numbers<[1], [0], [0], [1], [0, 0, 1, 1], [], []>} : vector<10x16xf32>, vector<16x32xf32>, vector<10x32xf32> -> vector<10x32xf32>
    %c0_3 = arith.constant 0 : index
    %c0_4 = arith.constant 0 : index
    %3 = vector.load %arg3[%c0_3, %c0_4] : memref<10x1xf32, #tpu.memory_space<vmem>>, vector<10x1xf32>
    %4 = vector.broadcast %3 : vector<10x1xf32> to vector<10x32xf32>
    %5 = arith.addf %2, %4 : vector<10x32xf32>
    %cst_5 = arith.constant 0.000000e+00 : f32
    %6 = vector.broadcast %cst_5 : f32 to vector<10x32xf32>
    %7 = arith.maximumf %5, %6 : vector<10x32xf32>
    %c0_6 = arith.constant 0 : index
    %c0_7 = arith.constant 0 : index
    %8 = vector.load %arg4[%c0_6, %c0_7] : memref<4x10xf32, #tpu.memory_space<vmem>>, vector<4x10xf32>
    %cst_8 = arith.constant dense<0.000000e+00> : vector<4x32xf32>
    %9 = tpu.matmul %8, %7, %cst_8 {dimension_numbers = #tpu.dot_dimension_numbers<[1], [0], [0], [1], [0, 0, 1, 1], [], []>} : vector<4x10xf32>, vector<10x32xf32>, vector<4x32xf32> -> vector<4x32xf32>
    %c0_9 = arith.constant 0 : index
    %c0_10 = arith.constant 0 : index
    %10 = vector.load %arg5[%c0_9, %c0_10] : memref<4x1xf32, #tpu.memory_space<vmem>>, vector<4x1xf32>
    %11 = vector.broadcast %10 : vector<4x1xf32> to vector<4x32xf32>
    %12 = arith.addf %9, %11 : vector<4x32xf32>
    %cst_11 = arith.constant dense<0xFF800000> : vector<32xf32>
    %13 = vector.multi_reduction <maximumf>, %12, %cst_11 [0] : vector<4x32xf32> to vector<32xf32>
    %14 = vector.shape_cast %13 : vector<32xf32> to vector<1x32xf32>
    %15 = vector.broadcast %14 : vector<1x32xf32> to vector<4x32xf32>
    %16 = arith.subf %12, %15 : vector<4x32xf32>
    %17 = math.exp %16 : vector<4x32xf32>
    %cst_12 = arith.constant dense<0.000000e+00> : vector<32xf32>
    %18 = vector.multi_reduction <add>, %17, %cst_12 [0] : vector<4x32xf32> to vector<32xf32>
    %19 = vector.shape_cast %18 : vector<32xf32> to vector<1x32xf32>
    %20 = vector.broadcast %19 : vector<1x32xf32> to vector<4x32xf32>
    %21 = arith.divf %17, %20 : vector<4x32xf32>
    %c0_13 = arith.constant 0 : index
    %c0_14 = arith.constant 0 : index
    %22 = vector.load %arg6[%c0_13, %c0_14] : memref<4x32xf32, #tpu.memory_space<vmem>>, vector<4x32xf32>
    tpu.vector_store %arg6[%c0_13, %c0_14], %21 {strides = array<i32>} : memref<4x32xf32, #tpu.memory_space<vmem>>, vector<4x32xf32>,
    return
  }
  func.func @transform_0(%arg0: i32) -> (i32, i32) {
    %c0_i32 = arith.constant 0 : i32
    %c0_i32_0 = arith.constant 0 : i32
    return %c0_i32, %arg0 : i32, i32
  }
  func.func @transform_1(%arg0: i32) -> (i32, i32) {
    %c0_i32 = arith.constant 0 : i32
    %c0_i32_0 = arith.constant 0 : i32
    %c0_i32_1 = arith.constant 0 : i32
    return %c0_i32, %c0_i32_0 : i32, i32
  }
  func.func @transform_2(%arg0: i32) -> (i32, i32) {
    %c0_i32 = arith.constant 0 : i32
    %c0_i32_0 = arith.constant 0 : i32
    %c0_i32_1 = arith.constant 0 : i32
    return %c0_i32, %c0_i32_0 : i32, i32
  }
  func.func @transform_3(%arg0: i32) -> (i32, i32) {
    %c0_i32 = arith.constant 0 : i32
    %c0_i32_0 = arith.constant 0 : i32
    %c0_i32_1 = arith.constant 0 : i32
    return %c0_i32, %c0_i32_0 : i32, i32
  }
  func.func @transform_4(%arg0: i32) -> (i32, i32) {
    %c0_i32 = arith.constant 0 : i32
    %c0_i32_0 = arith.constant 0 : i32
    %c0_i32_1 = arith.constant 0 : i32
    return %c0_i32, %c0_i32_0 : i32, i32
  }
  func.func @transform_5(%arg0: i32) -> (i32, i32) {
    %c0_i32 = arith.constant 0 : i32
    %c0_i32_0 = arith.constant 0 : i32
    return %c0_i32, %arg0 : i32, i32
  }
}

</mosaic_0001>

<bundles_post_ra>
// kernel: actor_forward.1
= control target key start
LH: loop header
LB: loop body
LE: loop exit
PB: predicated region body
PF: predicated region fallthrough
CT: control target
= control target key end

     0   :  { %10 = vsyncpa [#allocation3], 0  ;;  %s302_s0 = inlined_call_operand.vmem [shape: f32[16,32], index: 0, kind: input, shape index: {}]   ;;  %s303_s1 = inlined_call_operand.hbm [shape: f32[10,16], index: 1, kind: input, shape index: {}]   ;;  %s304_s2 = inlined_call_operand.vmem [shape: f32[10,1], index: 2, kind: input, shape index: {}]   ;;  %s305_s3 = inlined_call_operand.vmem [shape: f32[4,10], index: 3, kind: input, shape index: {}]   ;;  %s306_s4 = inlined_call_operand.vmem [shape: f32[4,1], index: 4, kind: input, shape index: {}]   ;;  %s307_s5 = inlined_call_operand.hbm [shape: f32[4,32], index: 5, kind: output, shape index: {}]  }
   0x1   :  { %11 = vsyncpa [#allocation4], 0  ;;  %s18_s20 = sshll.u32 %s303_s1, 4  ;;  %s240_s21 = smov [#allocation2]   ;;  %s19_s20 = int_to_ptr.hbm [resolvable:$true] %s18_s20 }
   0x2   :  { %s20_s22 = sshll.u32 %s240_s21, 4  ;;  %s241_s23 = smov 128   ;;  %s21_s22 = int_to_ptr.vmem [resolvable:$true] %s20_s22 }
   0x3   :  { %s242_s24 = smov 8  }
   0x4   :  { %26 = dma.hbm_to_vmem [thread:$0]  %s19_s20, 256, %s21_s22, [#allocation3], %s241_s23, %s241_s23, %s242_s24  }
   0x5   :  { %236 = dma.done.wait [#allocation3], 256  }
   0x6   :  { %237 = vsyncadd [#allocation3], 4294967040  ;;  %v243_v0 = vmov 0   ;;  %v38_v1 = vld [vmem:[%s302_s0 + $0x8] sm:$0xff]  ;;  %v37_v2 = vld [vmem:[%s302_s0] sm:$0xff]  ;;  %vm53_vm0 = vcmask 130048  }
   0x7   :  { %182 = vset.pattern.permute.xlu0 %v243_v0  ;;  %183 = vset.pattern.permute.xlu1 %v243_v0  ;;  %v39_v3 = vld [vmem:[#allocation2] sm:$0xff]  ;;  %v40_v4 = vld [vmem:[#allocation2 + $0x8] sm:$0x3]  ;;  %vm96_vm1 = vcmask 1041408   ;;  %vm92_vm2 = vcmask 80896   ;;  %vm120_vm3 = vcmask 257024  }
   0x8   :  { %74 = vmatpush.msra.mxu0 %v38_v1  ;;  %175 = vmatpush.msra.mxu2 %v38_v1  ;;  %v42_v5 = vld [vmem:[%s304_s2 + $0x8] sm:$0x3]  ;;  %v41_v6 = vld [vmem:[%s304_s2] sm:$0xff]  ;;  %s244_s2 = smov [#allocation5]   ;;  %s161_s11 = sshll.u32 %s307_s5, 4  ;;  %s162_s11 = int_to_ptr.hbm [resolvable:$true] %s161_s11 }
   0x9   :  { %50 = vperm.xlu0 %182, %v42_v5   ;;  %v86_v7 = vld [vmem:[%s306_s4] sm:$0xf] }
   0xa   :  { %75 = vmatpush.msra.mxu0 %v37_v2  ;;  %176 = vmatpush.msra.mxu2 %v37_v2  ;;  %v85_v16 = vld [vmem:[%s305_s3] sm:$0xf]  ;;  %s159_s3 = sshll.u32 %s244_s2, 4  ;;  %s160_s3 = int_to_ptr.vmem [resolvable:$true] %s159_s3 }
   0xb   :  { %171 = vmatmul.msk.f32.vlgmr.msra.gmra.mxu0 %vm53_vm0, %v39_v3  ;;  %172 = vmatmul.msk.f32.vlgmr.msra.gmra.mxu2 %vm53_vm0, %v40_v4 }
   0xc   :  { %89 = vperm.xlu1 %183, %v86_v7  }
  0x11   :  { %45 = vperm.xlu0 %182, %v41_v6  }
  0x7b   :  { %v51_v8 = vpop.permute.xlu0 %50 }
  0x7e   :  { %v90_v17 = vpop.permute.xlu1 %89 }
  0x83   :  { %v46_v9 = vpop.permute.xlu0 %45 }
  0x88   :  { %v77_v10 = vpop.f32.mrf.mxu0 }
  0x89   :  { %v78_v12 = vadd.f32 %v77_v10, %v46_v9 }
  0x8b   :  { %v83_v15 = vmax.f32 %v78_v12, 0.0 }
  0x8e   :  { %v80_v11 = vpop.f32.mrf.mxu2 }
  0x8f   :  { %v81_v13 = vadd.f32 %v80_v11, %v51_v8 }
  0x91   :  { %v84_v14 = vmax.f32 %v81_v13, 0.0 }
  0x93   :  { %173 = vmatpush.msk.msra.mxu1 %vm96_vm1, %v84_v14 }
  0x95   :  { %115 = vmatpush.msra.mxu1 %v83_v15 }
  0x96   :  { %174 = vmatmul.msk.f32.vlgmr.msra.gmra.mxu1 %vm92_vm2, %v85_v16 }
 0x113   :  { %v117_v18 = vpop.f32.mrf.mxu1 }
 0x114   :  { %v118_v19 = vadd.f32 %v117_v18, %v90_v17 }
 0x116   :  { %v121_v20 = vsel %vm120_vm3, %v118_v19, -inf }
 0x117   :  { %v122_v21 = vrot.slane %v121_v20, 4 }
 0x119   :  { %v123_v22 = vmax.f32 %v121_v20, %v122_v21 }
 0x11b   :  { %v124_v23 = vrot.slane %v123_v22, 2 }
 0x11d   :  { %v125_v24 = vmax.f32 %v123_v22, %v124_v23 }
 0x11f   :  { %v126_v25 = vrot.slane %v125_v24, 1 }
 0x121   :  { %v127_v26 = vmax.f32 %v125_v24, %v126_v25 }
 0x123   :  { %v128_v27 = vsub.f32 %v118_v19, %v127_v26 }
 0x125   :  { %v129_v28 = vmul.f32 1.442695, %v128_v27 }
 0x127   :  { %184 = vpow2.f32 %v129_v28 }
 0x12d   :  { %v185_v29 = vpop.eup %184 }
 0x12e   :  { %v131_v30 = vsel %vm120_vm3, %v185_v29, 0.0 }
 0x12f   :  { %v132_v31 = vrot.slane %v131_v30, 4 }
 0x131   :  { %v133_v32 = vadd.f32 %v132_v31, %v131_v30 }
 0x133   :  { %v134_v33 = vrot.slane %v133_v32, 2 }
 0x135   :  { %v135_v34 = vadd.f32 %v134_v33, %v133_v32 }
 0x137   :  { %v136_v35 = vrot.slane %v135_v34, 1 }
 0x139   :  { %v137_v36 = vadd.f32 %v136_v35, %v135_v34 }
 0x13b   :  { %186 = vrcp.f32 %v137_v36  ;;  %v149_v40 = vand.u32 2147483648, %v137_v36  ;;  %v147_v42 = vand.u32 2147483647, %v137_v36  ;;  %vm143_vm5 = vweird.f32 %v137_v36 }
 0x13d   :  { %v150_v44 = vor.u32 1.1754944e-38, %v149_v40  ;;  %vm148_vm7 = vcmp.eq.f32.partialorder %v147_v42, 8.507059e+37 }
 0x141   :  { %v187_v37 = vpop.eup %186 }
 0x142   :  { %v139_v38 = vmul.f32 %v187_v37, %v137_v36  ;;  %vm144_vm4 = vweird.f32 %v187_v37 }
 0x143   :  { %vm145_vm6 = vmor %vm143_vm5, %vm144_vm4 }
 0x144   :  { %v140_v39 = vsub.f32 1.0, %v139_v38 }
 0x146   :  { %v141_v41 = vmul.f32 %v187_v37, %v140_v39 }
 0x148   :  { %v142_v43 = vadd.f32 %v187_v37, %v141_v41 }
 0x14a   :  { %v146_v45 = vsel %vm145_vm6, %v187_v37, %v142_v43 }
 0x14b   :  { %v151_v46 = vsel %vm148_vm7, %v150_v44, %v146_v45 }
 0x14c   :  { %v152_v47 = vmul.f32 %v185_v29, %v151_v46 }
 0x14e   :  { %153 = vst.msk [vmem:[#allocation5] sm:$0xf] %vm120_vm3, %v152_v47 }
 0x14f   :  { %164 = dma.vmem_to_hbm [thread:$0]  %s160_s3, 64, %s162_s11, [#allocation4]  }
 0x150   :  { %238 = dma.done.wait [#allocation4], 64  }
 0x151   :  { %239 = vsyncadd [#allocation4], 4294967232 }
 0x152   :  { %169 = vsyncpa [#allocation3], 1 }
 0x153   :  { %170 = vsyncpa [#allocation4], 1 }

</bundles_post_ra>
